<compile_context>
chip_gen: v6e
topology: v6e:2x2x1
jax: 0.10.0
libtpu: 0.0.40
codegen_flags: <defaults>
</compile_context>

<pallas_src>
import jax
import jax.numpy as jnp
from jax import lax
from jax.experimental import pallas as pl
from jax.experimental.pallas import tpu as pltpu


# ---------------------------------------------------------------------------
# Input-projection kernel: one big GEMM over all timesteps (hoisted recurrence)
#   x2d: (M, D) bf16, w: (D, G*H) bf16, b: (1, G*H) f32  ->  (M, G*H) f32
# ---------------------------------------------------------------------------

def _proj_kernel(x_ref, w_ref, b_ref, o_ref):
    o_ref[...] = (jnp.dot(x_ref[...], w_ref[...],
                          preferred_element_type=jnp.float32)
                  + b_ref[...]).astype(o_ref.dtype)


def _input_projection(x2d, w_bf16, bias_f32, *, block_m=256):
    M, D = x2d.shape
    GH = w_bf16.shape[-1]
    bm = M if M <= block_m else block_m          # full M if small, else 8-aligned tile
    grid = (pl.cdiv(M, bm),)
    return pl.pallas_call(
        _proj_kernel,
        out_shape=jax.ShapeDtypeStruct((M, GH), jnp.float32),
        grid=grid,
        in_specs=[pl.BlockSpec((bm, D), lambda m: (m, 0)),
                  pl.BlockSpec((D, GH), lambda m: (0, 0)),   # weights resident
                  pl.BlockSpec((1, GH), lambda m: (0, 0))],
        out_specs=pl.BlockSpec((bm, GH), lambda m: (m, 0)),
        compiler_params=pltpu.CompilerParams(
            dimension_semantics=("parallel",)),
    )(x2d, w_bf16, bias_f32)


# ---------------------------------------------------------------------------
# Recurrent kernels (grid = (batch_chunks, time_chunks); only h@W_hh per step)
# ---------------------------------------------------------------------------

def _unroll_for(tt):
    if tt % 4 == 0:
        return 4
    if tt % 2 == 0:
        return 2
    return 1


def _lstm_rec_kernel(gi_ref, h0_ref, c0_ref, whh_ref,
                     y_ref, hT_ref, cT_ref, h_scr, c_scr):
    # gi_ref: (TT, BB, 4H) f32 = x @ W_ih + b_ih + b_hh (precomputed)
    # whh_ref: (H, 4H) bf16.  Gate order i, f, g, o (PyTorch).
    TT = gi_ref.shape[0]
    H = h0_ref.shape[-1]
    t_blk = pl.program_id(1)

    @pl.when(t_blk == 0)
    def _():
        h_scr[...] = h0_ref[...]
        c_scr[...] = c0_ref[...]

    whh = whh_ref[...]                      # resident bf16 weights

    def step(t, carry):
        h = h_scr[...]
        c = c_scr[...]
        gates = gi_ref[t] + jnp.dot(h.astype(whh.dtype), whh,
                                    preferred_element_type=jnp.float32)
        i = jax.nn.sigmoid(gates[:, 0 * H:1 * H])
        f = jax.nn.sigmoid(gates[:, 1 * H:2 * H])
        g = jnp.tanh(gates[:, 2 * H:3 * H])
        o = jax.nn.sigmoid(gates[:, 3 * H:4 * H])
        c_new = f * c + i * g
        h_new = o * jnp.tanh(c_new)
        h_scr[...] = h_new
        c_scr[...] = c_new
        y_ref[t] = h_new.astype(y_ref.dtype)
        return carry

    lax.fori_loop(0, TT, step, 0, unroll=_unroll_for(TT))

    @pl.when(t_blk == pl.num_programs(1) - 1)
    def _():
        hT_ref[...] = h_scr[...]
        cT_ref[...] = c_scr[...]


def _gru_rec_kernel(gi_ref, h0_ref, whh_ref, bhh_ref, y_ref, hT_ref, h_scr):
    # PyTorch GRU gate order r, z, n.  gi already contains x @ W_ih + b_ih.
    TT, BB, _ = gi_ref.shape
    H = h0_ref.shape[-1]
    t_blk = pl.program_id(1)

    @pl.when(t_blk == 0)
    def _():
        h_scr[...] = h0_ref[...]

    whh = whh_ref[...]
    bhh = jnp.broadcast_to(bhh_ref[...], (BB, 3 * H))    # broadcast hoisted out of loop

    def step(t, carry):
        h = h_scr[...]
        gi = gi_ref[t]
        gh = jnp.dot(h.astype(whh.dtype), whh,
                     preferred_element_type=jnp.float32) + bhh
        r = jax.nn.sigmoid(gi[:, 0 * H:1 * H] + gh[:, 0 * H:1 * H])
        z = jax.nn.sigmoid(gi[:, 1 * H:2 * H] + gh[:, 1 * H:2 * H])
        n = jnp.tanh(gi[:, 2 * H:3 * H] + r * gh[:, 2 * H:3 * H])
        h_new = (1.0 - z) * n + z * h
        h_scr[...] = h_new
        y_ref[t] = h_new.astype(y_ref.dtype)
        return carry

    lax.fori_loop(0, TT, step, 0, unroll=_unroll_for(TT))

    @pl.when(t_blk == pl.num_programs(1) - 1)
    def _():
        hT_ref[...] = h_scr[...]


def _rnn_rec_kernel(gi_ref, h0_ref, whh_ref, y_ref, hT_ref, h_scr):
    # Vanilla tanh-RNN.  gi already contains x @ W_ih + b_ih + b_hh.
    TT = gi_ref.shape[0]
    t_blk = pl.program_id(1)

    @pl.when(t_blk == 0)
    def _():
        h_scr[...] = h0_ref[...]

    whh = whh_ref[...]

    def step(t, carry):
        h = h_scr[...]
        h_new = jnp.tanh(gi_ref[t] + jnp.dot(h.astype(whh.dtype), whh,
                                             preferred_element_type=jnp.float32))
        h_scr[...] = h_new
        y_ref[t] = h_new.astype(y_ref.dtype)
        return carry

    lax.fori_loop(0, TT, step, 0, unroll=_unroll_for(TT))

    @pl.when(t_blk == pl.num_programs(1) - 1)
    def _():
        hT_ref[...] = h_scr[...]


# ---------------------------------------------------------------------------
# Chunk-size selection (VMEM-budget aware; v7x-safe) and the recurrent wrapper
# ---------------------------------------------------------------------------

def _largest_divisor_leq(n, target):
    target = max(1, min(n, target))
    for c in range(target, 0, -1):
        if n % c == 0:
            return c
    return 1


def _choose_batch_chunk(B, target=256):
    # Whole batch if it fits; else a multiple-of-8 divisor (BlockSpec sublane rule).
    if B <= target:
        return B
    for c in range(target - target % 8, 7, -8):
        if B % c == 0:
            return c
    return B


def _choose_time_chunk(T, BB, GH, H, budget_bytes=6 << 20):
    # Double-buffered gi-in + y-out chunks (f32) must fit the budget (v7x: 64 MiB VMEM).
    per_t = max(1, BB * 4 * (2 * GH + 2 * H))
    target = max(1, min(128, budget_bytes // per_t))
    return _largest_divisor_leq(T, target)


def _run_recurrent(kernel, gi, states, consts, H):
    """Run one recurrent layer.  gi: (T, B, G*H) f32 pre-projected gate inputs."""
    T, B, GH = gi.shape
    n_state = len(states)
    BB = _choose_batch_chunk(B)
    TT = _choose_time_chunk(T, BB, GH, H)
    grid = (B // BB, T // TT)

    gi_spec = pl.BlockSpec((TT, BB, GH), lambda b, t: (t, b, 0))
    st_spec = pl.BlockSpec((BB, H), lambda b, t: (b, 0))
    y_spec = pl.BlockSpec((TT, BB, H), lambda b, t: (t, b, 0))
    const_specs = [pl.BlockSpec(tuple(c.shape), lambda b, t: (0, 0)) for c in consts]

    # VMEM budget: double-buffered pipeline slabs + resident weights + state/scratch.
    est = (2 * TT * BB * GH * 4 + 2 * TT * BB * H * 4
           + 4 * n_state * BB * H * 4 + n_state * BB * H * 4
           + sum(2 * int(c.size) * c.dtype.itemsize for c in consts))
    vmem_limit = int(min(max(2 * est, 32 << 20), 96 << 20))

    outs = pl.pallas_call(
        kernel,
        out_shape=(jax.ShapeDtypeStruct((T, B, H), jnp.float32),)
        + tuple(jax.ShapeDtypeStruct((B, H), jnp.float32) for _ in range(n_state)),
        grid=grid,
        in_specs=[gi_spec] + [st_spec] * n_state + const_specs,
        out_specs=(y_spec,) + (st_spec,) * n_state,
        scratch_shapes=[pltpu.VMEM((BB, H), jnp.float32) for _ in range(n_state)],
        compiler_params=pltpu.CompilerParams(
            dimension_semantics=("parallel", "arbitrary"),   # batch || , time sequential
            vmem_limit_bytes=vmem_limit),
    )(gi, *states, *consts)
    return outs[0], tuple(outs[1:])


# ---------------------------------------------------------------------------
# HyberRnnNet in JAX
# ---------------------------------------------------------------------------

class HyberRnnNet:
    """JAX/Pallas port of model/Modules.py::HyberRnnNet (unidirectional, eval mode)."""

    _NUM_GATES = {'rnn': 1, 'gru': 3, 'lstm': 4}

    def __init__(self, inputs_dim, hidden_hat_dim, layer_nums, rnn_type,
                 bidirectional=False, key=jax.random.PRNGKey(42)):
        if rnn_type not in ('rnn', 'gru', 'lstm'):
            raise ValueError('rnn_type should be rnn, gru or lstm!')
        if bidirectional:
            raise NotImplementedError('bidirectional=True not implemented')  # TODO(synk)
        self.inputs_dim = inputs_dim
        self.hidden_hat_dim = hidden_hat_dim
        self.layer_nums = layer_nums
        self.rnn_type = rnn_type
        self.bidirectional = bidirectional

        G = self._NUM_GATES[rnn_type]
        H = hidden_hat_dim
        k = 1.0 / jnp.sqrt(jnp.float32(H))     # PyTorch uniform(-1/sqrt(H), 1/sqrt(H))
        self.params = []
        for layer in range(layer_nums):
            d_in = inputs_dim if layer == 0 else hidden_hat_dim
            key, k1, k2, k3, k4 = jax.random.split(key, 5)
            wih = jax.random.uniform(k1, (G * H, d_in), jnp.float32, -k, k)
            whh = jax.random.uniform(k2, (G * H, H), jnp.float32, -k, k)
            bih = jax.random.uniform(k3, (G * H,), jnp.float32, -k, k)
            bhh = jax.random.uniform(k4, (G * H,), jnp.float32, -k, k)
            wih_t = wih.T.astype(jnp.bfloat16)      # (d_in, G*H) bf16 MXU input
            whh_t = whh.T.astype(jnp.bfloat16)      # (H,    G*H) bf16 MXU input
            if rnn_type == 'gru':
                # n-gate needs r * (W_hn h + b_hn) -> keep b_hh separate.
                self.params.append((wih_t, whh_t,
                                    bih.reshape(1, -1), bhh.reshape(1, -1)))
            else:
                # LSTM / RNN: biases pre-combined and folded into the hoisted projection.
                self.params.append((wih_t, whh_t, (bih + bhh).reshape(1, -1)))

    def init_state(self, inputs, key=jax.random.PRNGKey(7)):
        B = inputs.shape[0]
        shape = (self.layer_nums, B, self.hidden_hat_dim)
        if self.rnn_type == 'lstm':
            k1, k2 = jax.random.split(key)
            return (jax.random.normal(k1, shape, jnp.float32),
                    jax.random.normal(k2, shape, jnp.float32))
        return jnp.zeros(shape, jnp.float32)

    def forward(self, inputs, state_0):
        # inputs: (B, T, inputs_dim), batch-first (matches PyTorch batch_first=True)
        x = jnp.transpose(inputs, (1, 0, 2)).astype(jnp.float32)   # (T, B, D) time-major
        T, B, _ = x.shape
        H = self.hidden_hat_dim

        if self.rnn_type == 'lstm':
            h_0, c_0 = state_0
            h_fin, c_fin = [], []
            for layer, (wih_t, whh_t, b_proj) in enumerate(self.params):
                D_in = x.shape[-1]
                gi = _input_projection(
                    x.reshape(T * B, D_in).astype(jnp.bfloat16), wih_t, b_proj
                ).reshape(T, B, 4 * H)
                x, (h_t, c_t) = _run_recurrent(
                    _lstm_rec_kernel, gi, (h_0[layer], c_0[layer]), (whh_t,), H)
                h_fin.append(h_t)
                c_fin.append(c_t)
            return (jnp.transpose(x, (1, 0, 2)),
                    (jnp.stack(h_fin, 0), jnp.stack(c_fin, 0)))

        if self.rnn_type == 'gru':
            h_fin = []
            for layer, (wih_t, whh_t, bih, bhh) in enumerate(self.params):
                D_in = x.shape[-1]
                gi = _input_projection(
                    x.reshape(T * B, D_in).astype(jnp.bfloat16), wih_t, bih
                ).reshape(T, B, 3 * H)
                x, (h_t,) = _run_recurrent(
                    _gru_rec_kernel, gi, (state_0[layer],), (whh_t, bhh), H)
                h_fin.append(h_t)
            return jnp.transpose(x, (1, 0, 2)), jnp.stack(h_fin, 0)

        # vanilla tanh-RNN
        h_fin = []
        for layer, (wih_t, whh_t, b_proj) in enumerate(self.params):
            D_in = x.shape[-1]
            gi = _input_projection(
                x.reshape(T * B, D_in).astype(jnp.bfloat16), wih_t, b_proj
            ).reshape(T, B, H)
            x, (h_t,) = _run_recurrent(
                _rnn_rec_kernel, gi, (state_0[layer],), (whh_t,), H)
            h_fin.append(h_t)
        return jnp.transpose(x, (1, 0, 2)), jnp.stack(h_fin, 0)

    __call__ = forward


# ---------------------------------------------------------------------------
# Pure-JAX reference (same bf16-matmul / f32-accumulate math, lax.scan over time)
# ---------------------------------------------------------------------------

def _reference_forward(net, inputs, state_0):
    x = jnp.transpose(inputs, (1, 0, 2)).astype(jnp.float32)
    H = net.hidden_hat_dim

    def proj(xs, w, b):
        return jnp.dot(xs.astype(jnp.bfloat16), w,
                       preferred_element_type=jnp.float32) + b

    def hdot(h, w):
        return jnp.dot(h.astype(jnp.bfloat16), w, preferred_element_type=jnp.float32)

    if net.rnn_type == 'lstm':
        h_0, c_0 = state_0
        h_fin, c_fin = [], []
        for layer, (wih_t, whh_t, b_proj) in enumerate(net.params):
            gi = proj(x, wih_t, b_proj)

            def step(carry, gi_t, whh_t=whh_t):
                h, c = carry
                g = gi_t + hdot(h, whh_t)
                i = jax.nn.sigmoid(g[:, :H]); f = jax.nn.sigmoid(g[:, H:2 * H])
                gg = jnp.tanh(g[:, 2 * H:3 * H]); o = jax.nn.sigmoid(g[:, 3 * H:])
                c = f * c + i * gg
                h = o * jnp.tanh(c)
                return (h, c), h

            (h_t, c_t), x = lax.scan(step, (h_0[layer], c_0[layer]), gi)
            h_fin.append(h_t); c_fin.append(c_t)
        return (jnp.transpose(x, (1, 0, 2)),
                (jnp.stack(h_fin, 0), jnp.stack(c_fin, 0)))

    if net.rnn_type == 'gru':
        h_fin = []
        for layer, (wih_t, whh_t, bih, bhh) in enumerate(net.params):
            gi = proj(x, wih_t, bih)

            def step(h, gi_t, whh_t=whh_t, bhh=bhh):
                gh = hdot(h, whh_t) + bhh
                r = jax.nn.sigmoid(gi_t[:, :H] + gh[:, :H])
                z = jax.nn.sigmoid(gi_t[:, H:2 * H] + gh[:, H:2 * H])
                n = jnp.tanh(gi_t[:, 2 * H:3 * H] + r * gh[:, 2 * H:3 * H])
                h = (1.0 - z) * n + z * h
                return h, h

            h_t, x = lax.scan(step, state_0[layer], gi)
            h_fin.append(h_t)
        return jnp.transpose(x, (1, 0, 2)), jnp.stack(h_fin, 0)

    h_fin = []
    for layer, (wih_t, whh_t, b_proj) in enumerate(net.params):
        gi = proj(x, wih_t, b_proj)

        def step(h, gi_t, whh_t=whh_t):
            h = jnp.tanh(gi_t + hdot(h, whh_t))
            return h, h

        h_t, x = lax.scan(step, state_0[layer], gi)
        h_fin.append(h_t)
    return jnp.transpose(x, (1, 0, 2)), jnp.stack(h_fin, 0)


# ---------------------------------------------------------------------------
# Demo
# ---------------------------------------------------------------------------

if __name__ == "__main__":
    B, T, D_IN, H, L = 2, 8, 16, 32, 2
    key = jax.random.PRNGKey(0)
    kx, ks = jax.random.split(key)
    x = jax.random.normal(kx, (B, T, D_IN), jnp.float32)

    TOL = dict(atol=5e-3, rtol=5e-3)   # bf16 MXU inputs -> looser than pure-f32

    # LSTM (primary config)
    net = HyberRnnNet(D_IN, H, L, 'lstm')
    state0 = net.init_state(x, ks)
    out, (h_t, c_t) = jax.block_until_ready(net(x, state0))
    assert out.shape == (B, T, H) and h_t.shape == (L, B, H) and c_t.shape == (L, B, H)
    ref_out, (ref_h, ref_c) = _reference_forward(net, x, state0)
    assert jnp.allclose(out, ref_out, **TOL)
    assert jnp.allclose(h_t, ref_h, **TOL)
    assert jnp.allclose(c_t, ref_c, **TOL)

    # GRU and vanilla-RNN paths
    for rtype in ('gru', 'rnn'):
        net2 = HyberRnnNet(D_IN, H, L, rtype)
        s0 = net2.init_state(x)
        o2, h2 = jax.block_until_ready(net2(x, s0))
        assert o2.shape == (B, T, H) and h2.shape == (L, B, H)
        r_o, r_h = _reference_forward(net2, x, s0)
        assert jnp.allclose(o2, r_o, **TOL)
        assert jnp.allclose(h2, r_h, **TOL)

    print("KERNEL_OK")
</pallas_src>

<mosaic_0001>
module attributes {stable_mosaic.version = 11 : i64} {
  func.func @_proj_kernel(%arg0: i32, %arg1: memref<16x16xbf16, #tpu.memory_space<vmem>>, %arg2: memref<16x128xbf16, #tpu.memory_space<vmem>>, %arg3: memref<1x128xf32, #tpu.memory_space<vmem>>, %arg4: memref<16x128xf32, #tpu.memory_space<vmem>>) attributes {dimension_semantics = [#tpu.dimension_semantics<parallel>], iteration_bounds = array<i64: 1>, scalar_prefetch = 0 : i64, scratch_operands = 0 : i64, tpu.core_type = #tpu.core_type<tc>, window_params = [{transform_indices = @transform_0, window_bounds = array<i64: 16, 16>}, {pipeline_mode = #tpu.pipeline_mode<synchronous>, transform_indices = @transform_1, window_bounds = array<i64: 16, 128>}, {pipeline_mode = #tpu.pipeline_mode<synchronous>, transform_indices = @transform_2, window_bounds = array<i64: 1, 128>}, {transform_indices = @transform_3, window_bounds = array<i64: 16, 128>}]} {
    %c0 = arith.constant 0 : index
    %c0_0 = arith.constant 0 : index
    %0 = vector.load %arg1[%c0, %c0_0] : memref<16x16xbf16, #tpu.memory_space<vmem>>, vector<16x16xbf16>
    %c0_1 = arith.constant 0 : index
    %c0_2 = arith.constant 0 : index
    %1 = vector.load %arg2[%c0_1, %c0_2] : memref<16x128xbf16, #tpu.memory_space<vmem>>, vector<16x128xbf16>
    %cst = arith.constant dense<0.000000e+00> : vector<16x128xf32>
    %2 = tpu.matmul %0, %1, %cst {dimension_numbers = #tpu.dot_dimension_numbers<[1], [0], [0], [1], [0, 0, 1, 1], [], []>} : vector<16x16xbf16>, vector<16x128xbf16>, vector<16x128xf32> -> vector<16x128xf32>
    %c0_3 = arith.constant 0 : index
    %c0_4 = arith.constant 0 : index
    %3 = vector.load %arg3[%c0_3, %c0_4] : memref<1x128xf32, #tpu.memory_space<vmem>>, vector<1x128xf32>
    %4 = vector.broadcast %3 : vector<1x128xf32> to vector<16x128xf32>
    %5 = arith.addf %2, %4 : vector<16x128xf32>
    %c0_5 = arith.constant 0 : index
    %c0_6 = arith.constant 0 : index
    %6 = vector.load %arg4[%c0_5, %c0_6] : memref<16x128xf32, #tpu.memory_space<vmem>>, vector<16x128xf32>
    tpu.vector_store %arg4[%c0_5, %c0_6], %5 {strides = array<i32>} : memref<16x128xf32, #tpu.memory_space<vmem>>, vector<16x128xf32>,
    return
  }
  func.func @transform_0(%arg0: i32) -> (i32, i32) {
    %c0_i32 = arith.constant 0 : i32
    %c0_i32_0 = arith.constant 0 : i32
    return %arg0, %c0_i32 : i32, i32
  }
  func.func @transform_1(%arg0: i32) -> (i32, i32) {
    %c0_i32 = arith.constant 0 : i32
    %c0_i32_0 = arith.constant 0 : i32
    %c0_i32_1 = arith.constant 0 : i32
    return %c0_i32, %c0_i32_0 : i32, i32
  }
  func.func @transform_2(%arg0: i32) -> (i32, i32) {
    %c0_i32 = arith.constant 0 : i32
    %c0_i32_0 = arith.constant 0 : i32
    %c0_i32_1 = arith.constant 0 : i32
    return %c0_i32, %c0_i32_0 : i32, i32
  }
  func.func @transform_3(%arg0: i32) -> (i32, i32) {
    %c0_i32 = arith.constant 0 : i32
    %c0_i32_0 = arith.constant 0 : i32
    return %arg0, %c0_i32 : i32, i32
  }
}

</mosaic_0001>

<bundles_post_ra>
// kernel: tpu_custom_call.1
= control target key start
LH: loop header
LB: loop body
LE: loop exit
PB: predicated region body
PF: predicated region fallthrough
CT: control target
= control target key end

     0   :  { %8 = vsyncpa [#allocation3], 0  ;;  %s261_s0 = inlined_call_operand.hbm [shape: bf16[16,16], index: 0, kind: input, shape index: {}]   ;;  %s262_s1 = inlined_call_operand.hbm [shape: bf16[16,128], index: 1, kind: input, shape index: {}]   ;;  %s263_s2 = inlined_call_operand.vmem [shape: f32[1,128], index: 2, kind: input, shape index: {}]   ;;  %s264_s3 = inlined_call_operand.hbm [shape: f32[16,128], index: 3, kind: output, shape index: {}]  }
   0x1   :  { %9 = vsyncpa [#allocation6], 0 }
   0x2   :  { %10 = vsyncpa [#allocation4], 0  ;;  %s220_s12 = smov [#allocation2]  }
   0x3   :  { %s16_s13 = sshll.u32 %s220_s12, 4  ;;  %s17_s13 = int_to_ptr.vmem [resolvable:$true] %s16_s13 }
   0x4   :  { %s162_s14 = scalar_lea.vmem %s17_s13, 128  ;;  %p167_p1 = scmp.lt.s32.totalorder %s17_s13, %s17_s13 }
   0x5   :  { %p163_p0 = scmp.ne.s32.totalorder %s17_s13, %s162_s14  ;;  %p168_p2 = scmp.lt.s32.totalorder %s162_s14, %s162_s14 }
   0x7   :  { %p169_p3 = por %p168_p2, %p167_p1 }
   0x9   :  { %p170_p4 = pnand %p169_p3, %p163_p0 }
   0xb   :  { %173 = shalt.err (!%p170_p4)
}
   0xc   :  { %s221_s15 = smov 64   ;;  %s222_s16 = smov 4  }
   0xd   :  { %22 = dma.hbm_to_vmem [thread:$0]  %s261_s0, 128, %s17_s13, [#allocation3], %s221_s15, %s221_s15, %s222_s16  }
   0xe   :  { %s223_s19 = smov [#allocation5]  }
   0xf   :  { %s28_s20 = sshll.u32 %s223_s19, 4  ;;  %s29_s20 = int_to_ptr.vmem [resolvable:$true] %s28_s20 }
  0x10   :  { %s182_s21 = scalar_lea.vmem %s29_s20, 128  ;;  %p187_p6 = scmp.lt.s32.totalorder %s29_s20, %s29_s20 }
  0x11   :  { %p183_p5 = scmp.ne.s32.totalorder %s29_s20, %s182_s21  ;;  %p188_p7 = scmp.lt.s32.totalorder %s182_s21, %s182_s21 }
  0x13   :  { %p189_p8 = por %p188_p7, %p187_p6 }
  0x15   :  { %p190_p9 = pnand %p189_p8, %p183_p5 }
  0x17   :  { %193 = shalt.err (!%p190_p9)
}
  0x18   :  { %34 = dma.hbm_to_vmem [thread:$0]  %s262_s1, 128, %s29_s20, [#allocation6], %s221_s15, %s221_s15, %s222_s16  }
  0x19   :  { %214 = dma.done.wait [#allocation3], 128  }
  0x1a   :  { %215 = vsyncadd [#allocation3], 4294967168 }
  0x1b   :  { %216 = dma.done.wait [#allocation6], 128  }
  0x1c   :  { %217 = vsyncadd [#allocation6], 4294967168  ;;  %v224_v0 = vmov 0.0   ;;  %vm225_vm0 = vmmov 0   ;;  %v152_v1 = vld [vmem:[#allocation5] sm:$0xff]   ;;  %v153_v2 = vld [vmem:[#allocation2] sm:$0xff]  }
  0x1d   :  { %137 = vmatprep.subr.bf16.mxu0 %v224_v0  ;;  %139 = vmatprep.mubr.msk.bf16.mxu0 %vm225_vm0, %v224_v0  ;;  %vm66_vm1 = vcmask 130048   ;;  %v131_v3 = vld [vmem:[%s263_s2] ss:$0 sm:$0xff]  ;;  %s226_s1 = smov [#allocation7]  }
  0x1e   :  { %138 = vmatpush3.bf16.msra.mxu0 %v152_v1  ;;  %s118_s25 = sshll.u32 %s226_s1, 4  ;;  %s119_s25 = int_to_ptr.vmem [resolvable:$true] %s118_s25 }
  0x1f   :  { %s194_s26 = scalar_lea.vmem %s119_s25, 256  ;;  %p199_p11 = scmp.lt.s32.totalorder %s119_s25, %s119_s25 }
  0x20   :  { %p195_p10 = scmp.ne.s32.totalorder %s119_s25, %s194_s26  ;;  %p200_p12 = scmp.lt.s32.totalorder %s194_s26, %s194_s26 }
  0x21   :  { %140 = vmatmul.mubr.msk.bf16.vlgmr.msra.gmra.mxu0 %vm66_vm1, %v153_v2 }
  0x22   :  { %p201_p13 = por %p200_p12, %p199_p11 }
  0x24   :  { %p202_p0 = pnand %p201_p13, %p195_p10 }
  0xe1   :  { %v104_v4 = vpop.f32.mrf.mxu0 }
  0xe2   :  { %v105_v5 = vadd.f32 %v131_v3, %v104_v4 }
  0xe3   :  { %v141_v6 = vpop.f32.mrf.mxu0 }
  0xe4   :  { %111 = vst [vmem:[#allocation7] sm:$0xff] %v105_v5 }
  0xe5   :  { %v107_v7 = vpop.f32.mrf.mxu0 }
  0xe6   :  { %v108_v8 = vadd.f32 %v131_v3, %v107_v7 }
  0xe7   :  { %v142_v9 = vpop.f32.mrf.mxu0 }
  0xe8   :  { %112 = vst [vmem:[#allocation7 + $0x8] sm:$0xff] %v108_v8 }
  0xe9   :  { %205 = shalt.err (!%p202_p0)
}
  0xea   :  { %s227_s27 = smov 128   ;;  %s228_s2 = smov 8  }
  0xeb   :  { %124 = dma.vmem_to_hbm [thread:$0]  %s119_s25, 256, %s264_s3, [#allocation4], %s227_s27, %s227_s27, %s228_s2  }
  0xec   :  { %218 = dma.done.wait [#allocation4], 256  }
  0xed   :  { %219 = vsyncadd [#allocation4], 4294967040 }
  0xee   :  { %128 = vsyncpa [#allocation3], 1 }
  0xef   :  { %129 = vsyncpa [#allocation6], 1 }
  0xf0   :  { %130 = vsyncpa [#allocation4], 1 }

</bundles_post_ra>
